<compile_context>
chip_gen: v5e
topology: v5e:2x2
jax: 0.10.0
libtpu: 0.0.40
codegen_flags: <defaults>
</compile_context>

<pallas_src>
import functools

import jax
import jax.numpy as jnp
from jax.experimental import pallas as pl
from jax.experimental.pallas import tpu as pltpu


def _round_up(x, m):
    return (x + m - 1) // m * m


def _ceil_div(a, b):
    return -(-a // b)


def _plan_rows(n, target_tile=768):
    """Pick (tile_m, n_pad) so the grid has an even number of steps (>=2).

    Even step counts keep v7x's two TensorCores balanced; ~768-row tiles keep
    each x DMA >= ~2 MB so the ~0.35 us per-step overhead is negligible.
    tile_m is a multiple of 16 for bf16 sublane packing.
    """
    steps = max(2, _ceil_div(n, target_tile))
    if steps % 2:
        steps += 1
    tile_m = _round_up(_ceil_div(n, steps), 16)
    n_pad = tile_m * steps
    return tile_m, n_pad


def _make_mlp_kernel(training: bool):
    """Fused kernel: (x @ W1 + b1) -> relu -> [dropout] -> (@ W2 + b2)."""

    if training:
        def kernel(seed_ref, x_ref, w1_ref, b1_ref, w2_ref, b2_ref, o_ref):
            # lin1: bf16 operands, f32 accumulation on the MXU, then relu.
            h = jnp.dot(x_ref[...], w1_ref[...],
                        preferred_element_type=jnp.float32)
            h = jnp.maximum(h + b1_ref[...], 0.0)
            # dropout p=0.5: keep iff the PRNG sign bit is set; the 1/(1-p)=2
            # scale is folded into the select (h + h), no extra vmul.
            pltpu.prng_seed(seed_ref[0] + pl.program_id(0))
            bits = pltpu.prng_random_bits(h.shape)
            keep = (pltpu.bitcast(bits, jnp.uint32)
                    & jnp.uint32(0x80000000)) != 0
            h = jnp.where(keep, h + h, 0.0)
            # lin2 (tiny: K=32), bf16 operands, f32 accumulation.
            o = jnp.dot(h.astype(jnp.bfloat16), w2_ref[...],
                        preferred_element_type=jnp.float32)
            o_ref[...] = (o + b2_ref[...]).astype(o_ref.dtype)

        return kernel

    def kernel(x_ref, w1_ref, b1_ref, w2_ref, b2_ref, o_ref):
        h = jnp.dot(x_ref[...], w1_ref[...],
                    preferred_element_type=jnp.float32)
        h = jnp.maximum(h + b1_ref[...], 0.0)
        o = jnp.dot(h.astype(jnp.bfloat16), w2_ref[...],
                    preferred_element_type=jnp.float32)
        o_ref[...] = (o + b2_ref[...]).astype(o_ref.dtype)

    return kernel


def prepare_inputs(x, w1, b1, w2, b2, *, target_tile=768):
    """One-time layout prep (pad + bf16 cast).  Hoisted out of the per-call
    path: the padded/cast arrays can be reused for every forward call.

    x : [N, F] float32, w1: [F, H], b1: [H], w2: [H, C], b2: [C]
    Returns (operands, meta) for `nn_forward`.
    """
    N, F = x.shape
    H = w1.shape[-1]
    C = w2.shape[-1]

    tile_m, n_pad = _plan_rows(N, target_tile)
    f_pad = _round_up(F, 128)   # lane-aligned K -> clean, unmasked row DMAs
    c_pad = _round_up(C, 128)   # lane-dense output -> unmasked full-lane vst

    x_p = jnp.pad(x, ((0, n_pad - N), (0, f_pad - F))).astype(jnp.bfloat16)
    w1_p = jnp.pad(w1, ((0, f_pad - F), (0, 0))).astype(jnp.bfloat16)
    b1_p = jnp.asarray(b1, jnp.float32).reshape(1, H)
    w2_p = jnp.pad(jnp.asarray(w2, jnp.float32),
                   ((0, 0), (0, c_pad - C))).astype(jnp.bfloat16)
    b2_p = jnp.pad(jnp.asarray(b2, jnp.float32).reshape(1, C),
                   ((0, 0), (0, c_pad - C)))

    operands = (x_p, w1_p, b1_p, w2_p, b2_p)
    meta = dict(tile_m=tile_m, n_rows=N, n_cols=C)
    return operands, meta


@functools.partial(jax.jit,
                   static_argnames=("tile_m", "n_rows", "n_cols", "training"))
def nn_forward(x_p, w1_p, b1_p, w2_p, b2_p, seed=None, *,
               tile_m, n_rows, n_cols, training=False):
    """Forward pass of the 2-layer MLP as a single fused Pallas kernel.

    Inputs must come from `prepare_inputs` (already padded / bf16-cast), so
    this jitted function contains no per-call layout ops beyond the final
    slice back to [n_rows, n_cols].
    """
    n_pad, _ = x_p.shape
    H = w1_p.shape[1]
    c_pad = w2_p.shape[1]
    f_pad = x_p.shape[1]

    grid = (n_pad // tile_m,)

    in_specs = [
        pl.BlockSpec((tile_m, f_pad), lambda i: (i, 0)),  # x tile (bf16)
        pl.BlockSpec((f_pad, H), lambda i: (0, 0)),       # W1 (resident, bf16)
        pl.BlockSpec((1, H), lambda i: (0, 0)),           # b1 (f32)
        pl.BlockSpec((H, c_pad), lambda i: (0, 0)),       # W2 (bf16, lane-pad)
        pl.BlockSpec((1, c_pad), lambda i: (0, 0)),       # b2 (f32, lane-pad)
    ]
    operands = (x_p, w1_p, b1_p, w2_p, b2_p)
    if training:
        # Seed scalar only exists in the training specialization.
        in_specs = [pl.BlockSpec(memory_space=pltpu.MemorySpace.SMEM)] + in_specs
        operands = (jnp.asarray(seed, jnp.int32).reshape(1),) + operands

    out = pl.pallas_call(
        _make_mlp_kernel(training),
        # bf16 padded output: halves the writeback + slice re-read traffic.
        out_shape=jax.ShapeDtypeStruct((n_pad, c_pad), jnp.bfloat16),
        grid_spec=pltpu.PrefetchScalarGridSpec(
            num_scalar_prefetch=0,
            grid=grid,
            in_specs=in_specs,
            out_specs=pl.BlockSpec((tile_m, c_pad), lambda i: (i, 0)),
        ),
        compiler_params=pltpu.CompilerParams(
            dimension_semantics=("parallel",),
        ),
    )(*operands)

    # Downstream consumers could read the padded bf16 block directly and skip
    # this slice; we return the exact [N, C] f32 logits for module parity.
    return out[:n_rows, :n_cols].astype(jnp.float32)


if __name__ == "__main__":
    # Shapes consistent with the Cora module: F=1433 features, C=7 classes,
    # hidden_channels=32; N=128 nodes (small subset for the demo).
    N, F, H, C = 128, 1433, 32, 7

    key = jax.random.PRNGKey(0)
    kx, kw1, kb1, kw2, kb2 = jax.random.split(key, 5)

    x = jax.random.normal(kx, (N, F), dtype=jnp.float32)

    # Deterministic synthetic parameter init (uniform, Linear-like scaling).
    lim1 = 1.0 / jnp.sqrt(F)
    w1 = jax.random.uniform(kw1, (F, H), jnp.float32, -lim1, lim1)
    b1 = jax.random.uniform(kb1, (H,), jnp.float32, -lim1, lim1)
    lim2 = 1.0 / jnp.sqrt(H)
    w2 = jax.random.uniform(kw2, (H, C), jnp.float32, -lim2, lim2)
    b2 = jax.random.uniform(kb2, (C,), jnp.float32, -lim2, lim2)

    # One-time prep (pad / bf16 cast), then eval-mode forward
    # (dropout = identity), as in `model.eval()`.
    operands, meta = prepare_inputs(x, w1, b1, w2, b2)
    logits = nn_forward(*operands, **meta, training=False)
    jax.block_until_ready(logits)

    # Reference check in plain f32 JAX.  Tolerance accounts for the deliberate
    # bf16 streaming of x / W1 / W2 and the bf16 output store; accumulation in
    # the kernel is still f32.
    ref = jnp.maximum(x @ w1 + b1, 0.0) @ w2 + b2
    assert logits.shape == (N, C)
    err = float(jnp.max(jnp.abs(logits - ref)))
    assert jnp.allclose(logits, ref, atol=2e-2, rtol=2e-2), f"max abs err {err}"

    # TODO(synk): training-mode dropout (training=True, seed=...) uses the TPU
    # hardware PRNG; deterministic per seed but cannot bit-match torch's
    # dropout stream.
    print("KERNEL_OK")
</pallas_src>

<mosaic_0001>
module attributes {stable_mosaic.version = 11 : i64} {
  func.func @kernel(%arg0: i32, %arg1: memref<64x1536xbf16, #tpu.memory_space<vmem>>, %arg2: memref<1536x32xbf16, #tpu.memory_space<vmem>>, %arg3: memref<1x32xf32, #tpu.memory_space<vmem>>, %arg4: memref<32x128xbf16, #tpu.memory_space<vmem>>, %arg5: memref<1x128xf32, #tpu.memory_space<vmem>>, %arg6: memref<64x128xbf16, #tpu.memory_space<vmem>>) attributes {dimension_semantics = [#tpu.dimension_semantics<parallel>], iteration_bounds = array<i64: 2>, scalar_prefetch = 0 : i64, scratch_operands = 0 : i64, tpu.core_type = #tpu.core_type<tc>, window_params = [{transform_indices = @transform_0, window_bounds = array<i64: 64, 1536>}, {pipeline_mode = #tpu.pipeline_mode<synchronous>, transform_indices = @transform_1, window_bounds = array<i64: 1536, 32>}, {pipeline_mode = #tpu.pipeline_mode<synchronous>, transform_indices = @transform_2, window_bounds = array<i64: 1, 32>}, {pipeline_mode = #tpu.pipeline_mode<synchronous>, transform_indices = @transform_3, window_bounds = array<i64: 32, 128>}, {pipeline_mode = #tpu.pipeline_mode<synchronous>, transform_indices = @transform_4, window_bounds = array<i64: 1, 128>}, {transform_indices = @transform_5, window_bounds = array<i64: 64, 128>}]} {
    %c0 = arith.constant 0 : index
    %c0_0 = arith.constant 0 : index
    %0 = vector.load %arg1[%c0, %c0_0] : memref<64x1536xbf16, #tpu.memory_space<vmem>>, vector<64x1536xbf16>
    %c0_1 = arith.constant 0 : index
    %c0_2 = arith.constant 0 : index
    %1 = vector.load %arg2[%c0_1, %c0_2] : memref<1536x32xbf16, #tpu.memory_space<vmem>>, vector<1536x32xbf16>
    %cst = arith.constant dense<0.000000e+00> : vector<64x32xf32>
    %2 = tpu.matmul %0, %1, %cst {dimension_numbers = #tpu.dot_dimension_numbers<[1], [0], [0], [1], [0, 0, 1, 1], [], []>} : vector<64x1536xbf16>, vector<1536x32xbf16>, vector<64x32xf32> -> vector<64x32xf32>
    %c0_3 = arith.constant 0 : index
    %c0_4 = arith.constant 0 : index
    %3 = vector.load %arg3[%c0_3, %c0_4] : memref<1x32xf32, #tpu.memory_space<vmem>>, vector<1x32xf32>
    %4 = vector.broadcast %3 : vector<1x32xf32> to vector<64x32xf32>
    %5 = arith.addf %2, %4 : vector<64x32xf32>
    %cst_5 = arith.constant 0.000000e+00 : f32
    %6 = vector.broadcast %cst_5 : f32 to vector<64x32xf32>
    %7 = arith.maximumf %5, %6 : vector<64x32xf32>
    %8 = arith.truncf %7 : vector<64x32xf32> to vector<64x32xbf16>
    %c0_6 = arith.constant 0 : index
    %c0_7 = arith.constant 0 : index
    %9 = vector.load %arg4[%c0_6, %c0_7] : memref<32x128xbf16, #tpu.memory_space<vmem>>, vector<32x128xbf16>
    %cst_8 = arith.constant dense<0.000000e+00> : vector<64x128xf32>
    %10 = tpu.matmul %8, %9, %cst_8 {dimension_numbers = #tpu.dot_dimension_numbers<[1], [0], [0], [1], [0, 0, 1, 1], [], []>} : vector<64x32xbf16>, vector<32x128xbf16>, vector<64x128xf32> -> vector<64x128xf32>
    %c0_9 = arith.constant 0 : index
    %c0_10 = arith.constant 0 : index
    %11 = vector.load %arg5[%c0_9, %c0_10] : memref<1x128xf32, #tpu.memory_space<vmem>>, vector<1x128xf32>
    %12 = vector.broadcast %11 : vector<1x128xf32> to vector<64x128xf32>
    %13 = arith.addf %10, %12 : vector<64x128xf32>
    %14 = arith.truncf %13 : vector<64x128xf32> to vector<64x128xbf16>
    %c0_11 = arith.constant 0 : index
    %c0_12 = arith.constant 0 : index
    %15 = vector.load %arg6[%c0_11, %c0_12] : memref<64x128xbf16, #tpu.memory_space<vmem>>, vector<64x128xbf16>
    tpu.vector_store %arg6[%c0_11, %c0_12], %14 {strides = array<i32>} : memref<64x128xbf16, #tpu.memory_space<vmem>>, vector<64x128xbf16>,
    return
  }
  func.func @transform_0(%arg0: i32) -> (i32, i32) {
    %c0_i32 = arith.constant 0 : i32
    %c0_i32_0 = arith.constant 0 : i32
    return %arg0, %c0_i32 : i32, i32
  }
  func.func @transform_1(%arg0: i32) -> (i32, i32) {
    %c0_i32 = arith.constant 0 : i32
    %c0_i32_0 = arith.constant 0 : i32
    %c0_i32_1 = arith.constant 0 : i32
    return %c0_i32, %c0_i32_0 : i32, i32
  }
  func.func @transform_2(%arg0: i32) -> (i32, i32) {
    %c0_i32 = arith.constant 0 : i32
    %c0_i32_0 = arith.constant 0 : i32
    %c0_i32_1 = arith.constant 0 : i32
    return %c0_i32, %c0_i32_0 : i32, i32
  }
  func.func @transform_3(%arg0: i32) -> (i32, i32) {
    %c0_i32 = arith.constant 0 : i32
    %c0_i32_0 = arith.constant 0 : i32
    %c0_i32_1 = arith.constant 0 : i32
    return %c0_i32, %c0_i32_0 : i32, i32
  }
  func.func @transform_4(%arg0: i32) -> (i32, i32) {
    %c0_i32 = arith.constant 0 : i32
    %c0_i32_0 = arith.constant 0 : i32
    %c0_i32_1 = arith.constant 0 : i32
    return %c0_i32, %c0_i32_0 : i32, i32
  }
  func.func @transform_5(%arg0: i32) -> (i32, i32) {
    %c0_i32 = arith.constant 0 : i32
    %c0_i32_0 = arith.constant 0 : i32
    return %arg0, %c0_i32 : i32, i32
  }
}

</mosaic_0001>

<bundles_post_ra>
// kernel: nn_forward.1
= control target key start
LH: loop header
LB: loop body
LE: loop exit
PB: predicated region body
PF: predicated region fallthrough
CT: control target
= control target key end

     0   :  { %s2613_s18 = smov 0   ;;  %s3112_s0 = inlined_call_operand.vmem [shape: bf16[128,1536], index: 0, kind: input, shape index: {}]   ;;  %s3113_s1 = inlined_call_operand.vmem [shape: bf16[1536,32], index: 1, kind: input, shape index: {}]   ;;  %s3114_s2 = inlined_call_operand.vmem [shape: f32[1,32], index: 2, kind: input, shape index: {}]   ;;  %s3115_s3 = inlined_call_operand.vmem [shape: bf16[32,128], index: 3, kind: input, shape index: {}]   ;;  %s3116_s4 = inlined_call_operand.vmem [shape: f32[1,128], index: 4, kind: input, shape index: {}]   ;;  %s3117_s5 = inlined_call_operand.vmem [shape: bf16[128,128], index: 5, kind: output, shape index: {}]  }
   0x1 LB: > { %s1786_s19 = sadd.s32 4294967295, %s2581_s18   ;;  %p1790_p0 = scmp.ge.s32.totalorder %s2581_s18, 1  ;;  %s2581_s18 = sphi %s2613_s18, %s15_s18  }
   0x2   : > { %p189_p1 = scmp.lt.s32.totalorder %s2581_s18, 3 }
   0x4   : > { %p190_p2 = pnand %p1790_p0, %p189_p1 }
   0x5   : > { %s1791_s9 = sshll.u32 (!%p190_p2), %s1786_s19, 3 }
   0x6   : > { %193 = sbr.rel (%p190_p2) target bundleno = 540 (0x21c), region = 40  ;;  %p219_p3 = scmp.lt.s32.totalorder (!%p190_p2), %s1791_s9, 15 }
   0xb   : > { %v2440_v0 = vld [vmem:[%s3113_s1 + $0x38] sm:$0xff]  ;;  %v2439_v1 = vld [vmem:[%s3113_s1 + $0x30] sm:$0xff]  ;;  %v2438_v6 = vld [vmem:[%s3113_s1 + $0x28] sm:$0xff]  ;;  %s3119_s9 = smov (!%p219_p3, %s1791_s9), 15  ;;  %vm1672_vm0 = vcmask 261120  }
   0xc   : > { %2554 = vmatpush.bf16.msra.mxu1 %v2440_v0  ;;  %1292 = vmatpush.bf16.msra.mxu0 %v2440_v0  ;;  %v2456_v2 = vld [vmem:[%s3113_s1 + $0xb8] sm:$0xff]  ;;  %v2455_v4 = vld [vmem:[%s3113_s1 + $0xb0] sm:$0xff]  ;;  %v2454_v7 = vld [vmem:[%s3113_s1 + $0xa8] sm:$0xff]  ;;  %s2564_s29 = smul.u32 48, %s3119_s9  ;;  %s1794_s23 = sshll.u32 %s3119_s9, 2 }
   0xd   : > { %v2464_v3 = vld [vmem:[%s3113_s1 + $0xf8] sm:$0xff]  ;;  %1350 = vmatpush.bf16.msra.mxu2 %v2456_v2  ;;  %v2463_v5 = vld [vmem:[%s3113_s1 + $0xf0] sm:$0xff]  ;;  %v2462_v8 = vld [vmem:[%s3113_s1 + $0xe8] sm:$0xff]  ;;  %s229_s26 = scalar_lea.vmem %s3117_s5, %s1794_s23 }
   0xe   : > { %1379 = vmatpush.bf16.msra.mxu3 %v2464_v3  ;;  %v2437_v9 = vld [vmem:[%s3113_s1 + $0x20] sm:$0xff]  ;;  %v2436_v12 = vld [vmem:[%s3113_s1 + $0x18] sm:$0xff]  ;;  %v2435_v15 = vld [vmem:[%s3113_s1 + $0x10] sm:$0xff]  ;;  %s2684_s14 = scalar_lea.vmem %s3112_s0, %s2564_s29 }
   0xf   : > { %v2453_v10 = vld [vmem:[%s3113_s1 + $0xa0] sm:$0xff]  ;;  %v2452_v13 = vld [vmem:[%s3113_s1 + $0x98] sm:$0xff]  ;;  %v2451_v16 = vld [vmem:[%s3113_s1 + $0x90] sm:$0xff] }
  0x10   : > { %2555 = vmatpush.bf16.msra.mxu1 %v2439_v1  ;;  %1293 = vmatpush.bf16.msra.mxu0 %v2439_v1  ;;  %v2461_v11 = vld [vmem:[%s3113_s1 + $0xe0] sm:$0xff]  ;;  %v2460_v14 = vld [vmem:[%s3113_s1 + $0xd8] sm:$0xff]  ;;  %v2459_v17 = vld [vmem:[%s3113_s1 + $0xd0] sm:$0xff] }
  0x11   : > { %1351 = vmatpush.bf16.msra.mxu2 %v2455_v4  ;;  %v2434_v18 = vld [vmem:[%s3113_s1 + $0x8] sm:$0xff]  ;;  %v2433_v21 = vld [vmem:[%s3113_s1] sm:$0xff]  ;;  %v2415_v23 = vld [vmem:[%s2684_s14 + $0xec] sm:$0xf0] }
  0x12   : > { %1380 = vmatpush.bf16.msra.mxu3 %v2463_v5  ;;  %v2450_v19 = vld [vmem:[%s3113_s1 + $0x88] sm:$0xff]  ;;  %v1893_v22 = vld [vmem:[%s2684_s14 + $0xc0] sm:$0xf]  ;;  %v2391_v25 = vld [vmem:[%s2684_s14 + $0x2c] sm:$0xf0] }
  0x13   : > { %v2458_v20 = vld [vmem:[%s3113_s1 + $0xc8] sm:$0xff]  ;;  %v1797_v24 = vld [vmem:[%s2684_s14] sm:$0xf]  ;;  %v2448_v26 = vld [vmem:[%s3113_s1 + $0x78] sm:$0xff]  ;;  %v1894_v31 = vor.u32 %v2415_v23, %v1893_v22 }
  0x14   : > { %2556 = vmatpush.bf16.msra.mxu1 %v2438_v6  ;;  %1294 = vmatpush.bf16.msra.mxu0 %v2438_v6  ;;  %v2472_v27 = vld [vmem:[%s3113_s1 + $0x138] sm:$0xff]  ;;  %v2449_v28 = vld [vmem:[%s3113_s1 + $0x80] sm:$0xff]  ;;  %v1805_v30 = vld [vmem:[%s2684_s14 + $0x8] sm:$0xf]  ;;  %v1798_v32 = vor.u32 %v2391_v25, %v1797_v24 }
  0x15   : > { %1352 = vmatpush.bf16.msra.mxu2 %v2454_v7  ;;  %v2457_v29 = vld [vmem:[%s3113_s1 + $0xc0] sm:$0xff]  ;;  %v2392_v33 = vld [vmem:[%s2684_s14 + $0x34] sm:$0xf0]  ;;  %v2386_v34 = vld [vmem:[%s2684_s14 + $0xc] sm:$0xf] }
  0x16   : > { %1381 = vmatpush.bf16.msra.mxu3 %v2462_v8  ;;  %v1807_v35 = vld [vmem:[%s2684_s14 + $0x38] sm:$0xf0]  ;;  %v2447_v38 = vld [vmem:[%s3113_s1 + $0x70] sm:$0xff]  ;;  %v1806_v40 = vor.u32 %v2392_v33, %v1805_v30  ;;  %v2446_v43 = vld [vmem:[%s3113_s1 + $0x68] sm:$0xff] }
  0x17   : > { %v2488_v36 = vld [vmem:[%s3113_s1 + $0x1b8] sm:$0xff]  ;;  %v2471_v39 = vld [vmem:[%s3113_s1 + $0x130] sm:$0xff]  ;;  %v1810_v41 = vor.u32 %v2386_v34, %v1807_v35  ;;  %v2470_v44 = vld [vmem:[%s3113_s1 + $0x128] sm:$0xff] }
  0x18   : > { %2557 = vmatpush.bf16.msra.mxu1 %v2437_v9  ;;  %1295 = vmatpush.bf16.msra.mxu0 %v2437_v9  ;;  %v2496_v37 = vld [vmem:[%s3113_s1 + $0x1f8] sm:$0xff]  ;;  %v2487_v42 = vld [vmem:[%s3113_s1 + $0x1b0] sm:$0xff]  ;;  %v2486_v46 = vld [vmem:[%s3113_s1 + $0x1a8] sm:$0xff] }
  0x19   : > { %1353 = vmatpush.bf16.msra.mxu2 %v2453_v10  ;;  %v2495_v45 = vld [vmem:[%s3113_s1 + $0x1f0] sm:$0xff]  ;;  %v2494_v47 = vld [vmem:[%s3113_s1 + $0x1e8] sm:$0xff]  ;;  %v2445_v48 = vld [vmem:[%s3113_s1 + $0x60] sm:$0xff] }
  0x1a   : > { %1382 = vmatpush.bf16.msra.mxu3 %v2461_v11  ;;  %v2469_v49 = vld [vmem:[%s3113_s1 + $0x120] sm:$0xff]  ;;  %v2427_v51 = vld [vmem:[%s2684_s14 + $0x14c] sm:$0xf0]  ;;  %v2444_v54 = vld [vmem:[%s3113_s1 + $0x58] sm:$0xff] }
  0x1b   : > { %v1941_v50 = vld [vmem:[%s2684_s14 + $0x120] sm:$0xf]  ;;  %v2403_v53 = vld [vmem:[%s2684_s14 + $0x8c] sm:$0xf0]  ;;  %v2468_v55 = vld [vmem:[%s3113_s1 + $0x118] sm:$0xff] }
  0x1c   : > { %2558 = vmatpush.bf16.msra.mxu1 %v2436_v12  ;;  %1296 = vmatpush.bf16.msra.mxu0 %v2436_v12  ;;  %v1845_v52 = vld [vmem:[%s2684_s14 + $0x60] sm:$0xf]  ;;  %v1853_v56 = vld [vmem:[%s2684_s14 + $0x68] sm:$0xf]  ;;  %v1942_v57 = vor.u32 %v2427_v51, %v1941_v50  ;;  %v2404_v59 = vld [vmem:[%s2684_s14 + $0x94] sm:$0xf0] }
  0x1d   : > { %1354 = vmatpush.bf16.msra.mxu2 %v2452_v13  ;;  %v1846_v58 = vor.u32 %v2403_v53, %v1845_v52  ;;  %v2398_v60 = vld [vmem:[%s2684_s14 + $0x6c] sm:$0xf]  ;;  %v1855_v61 = vld [vmem:[%s2684_s14 + $0x98] sm:$0xf0]  ;;  %v2443_v62 = vld [vmem:[%s3113_s1 + $0x50] sm:$0xff]  ;;  %v1854_v0 = vor.u32 %v2404_v59, %v1853_v56 }
  0x1e   : > { %1383 = vmatpush.bf16.msra.mxu3 %v2460_v14  ;;  %v2467_v63 = vld [vmem:[%s3113_s1 + $0x110] sm:$0xff]  ;;  %v1858_v1 = vor.u32 %v2398_v60, %v1855_v61  ;;  %v2485_v2 = vld [vmem:[%s3113_s1 + $0x1a0] sm:$0xff]  ;;  %v2442_v3 = vld [vmem:[%s3113_s1 + $0x48] sm:$0xff] }
  0x1f   : > { %v2466_v4 = vld [vmem:[%s3113_s1 + $0x108] sm:$0xff]  ;;  %v2493_v5 = vld [vmem:[%s3113_s1 + $0x1e0] sm:$0xff]  ;;  %v2484_v6 = vld [vmem:[%s3113_s1 + $0x198] sm:$0xff] }
  0x20   : > { %2559 = vmatpush.bf16.msra.mxu1 %v2435_v15  ;;  %1297 = vmatpush.bf16.msra.mxu0 %v2435_v15  ;;  %v2492_v7 = vld [vmem:[%s3113_s1 + $0x1d8] sm:$0xff]  ;;  %v2441_v8 = vld [vmem:[%s3113_s1 + $0x40] sm:$0xff]  ;;  %v1799_v12 = vld [vmem:[%s2684_s14 + $0x30] sm:$0xf0] }
  0x21   : > { %1355 = vmatpush.bf16.msra.mxu2 %v2451_v16  ;;  %v2465_v9 = vld [vmem:[%s3113_s1 + $0x100] sm:$0xff]  ;;  %v2480_v10 = vld [vmem:[%s3113_s1 + $0x178] sm:$0xff]  ;;  %v1813_v13 = vld [vmem:[%s2684_s14 + $0x10] sm:$0xf] }
  0x22   : > { %1384 = vmatpush.bf16.msra.mxu3 %v2459_v17  ;;  %v2385_v11 = vld [vmem:[%s2684_s14 + $0x4] sm:$0xf]  ;;  %v2393_v14 = vld [vmem:[%s2684_s14 + $0x3c] sm:$0xf0]  ;;  %v2479_v15 = vld [vmem:[%s3113_s1 + $0x170] sm:$0xff] }
  0x23   : > { %v1802_v16 = vor.u32 %v2385_v11, %v1799_v12  ;;  %v1814_v17 = vor.u32 %v2393_v14, %v1813_v13  ;;  %v2478_v22 = vld [vmem:[%s3113_s1 + $0x168] sm:$0xff]  ;;  %v2483_v25 = vld [vmem:[%s3113_s1 + $0x190] sm:$0xff]  ;;  %v2397_v33 = vld [vmem:[%s2684_s14 + $0x64] sm:$0xf] }
  0x24   : > { %2560 = vmatpush.bf16.msra.mxu1 %v2434_v18  ;;  %1298 = vmatpush.bf16.msra.mxu0 %v2434_v18  ;;  %v1901_v18 = vld [vmem:[%s2684_s14 + $0xc8] sm:$0xf]  ;;  %v2503_v30 = vld [vmem:[%s3113_s1 + $0x230] sm:$0xff]  ;;  %v2501_v50 = vld [vmem:[%s3113_s1 + $0x220] sm:$0xff] }
  0x25   : > { %1356 = vmatpush.bf16.msra.mxu2 %v2450_v19  ;;  %v2416_v19 = vld [vmem:[%s2684_s14 + $0xf4] sm:$0xf0]  ;;  %v1847_v34 = vld [vmem:[%s2684_s14 + $0x90] sm:$0xf0]  ;;  %v1861_v35 = vld [vmem:[%s2684_s14 + $0x70] sm:$0xf] }
  0x26   : > { %1385 = vmatpush.bf16.msra.mxu3 %v2458_v20  ;;  %v2410_v20 = vld [vmem:[%s2684_s14 + $0xcc] sm:$0xf]  ;;  %v1902_v23 = vor.u32 %v2416_v19, %v1901_v18  ;;  %v2500_v51 = vld [vmem:[%s3113_s1 + $0x218] sm:$0xff]  ;;  %v2473_v52 = vld [vmem:[%s3113_s1 + $0x140] sm:$0xff] }
  0x27   : > { %v2520_v53 = vld [vmem:[%s3113_s1 + $0x2b8] sm:$0xff]  ;;  %v2409_v56 = vld [vmem:[%s2684_s14 + $0xc4] sm:$0xf]  ;;  %v2417_v59 = vld [vmem:[%s2684_s14 + $0xfc] sm:$0xf0] }
  0x28   : > { %2561 = vmatpush.bf16.msra.mxu1 %v2433_v21  ;;  %1299 = vmatpush.bf16.msra.mxu0 %v2433_v21  ;;  %v1903_v21 = vld [vmem:[%s2684_s14 + $0xf8] sm:$0xf0]  ;;  %v2498_v60 = vld [vmem:[%s3113_s1 + $0x208] sm:$0xff]  ;;  %v2421_v12 = vld [vmem:[%s2684_s14 + $0x124] sm:$0xf] }
  0x29   : > { %1357 = vmatpush.bf16.msra.mxu2 %v2449_v28  ;;  %v1906_v24 = vor.u32 %v2410_v20, %v1903_v21  ;;  %v2504_v28 = vld [vmem:[%s3113_s1 + $0x238] sm:$0xff]  ;;  %v2526_v11 = vld [vmem:[%s3113_s1 + $0x2e8] sm:$0xff]  ;;  %v1943_v13 = vld [vmem:[%s2684_s14 + $0x150] sm:$0xf0] }
  0x2a   : > { %1386 = vmatpush.bf16.msra.mxu3 %v2457_v29  ;;  %v2482_v29 = vld [vmem:[%s3113_s1 + $0x188] sm:$0xff]  ;;  %v1957_v14 = vld [vmem:[%s2684_s14 + $0x130] sm:$0xf]  ;;  %v1869_v18 = vld [vmem:[%s2684_s14 + $0x78] sm:$0xf] }
  0x2b   : > { %1310 = vmatmul.bf16.vlgmr.msra.gmra.mxu1 %v1894_v31  ;;  %1300 = vmatmul.bf16.vlgmr.msra.gmra.mxu0 %v1798_v32  ;;  %v2490_v31 = vld [vmem:[%s3113_s1 + $0x1c8] sm:$0xff]  ;;  %v2476_v32 = vld [vmem:[%s3113_s1 + $0x158] sm:$0xff] }
  0x2c   : > { %1321 = vmatpush.bf16.msrb.mxu1 %v2448_v26  ;;  %1408 = vmatpush.bf16.msrb.mxu0 %v2472_v27  ;;  %v2491_v26 = vld [vmem:[%s3113_s1 + $0x1d0] sm:$0xff]  ;;  %v2477_v27 = vld [vmem:[%s3113_s1 + $0x160] sm:$0xff]  ;;  %v2406_v19 = vld [vmem:[%s2684_s14 + $0xa4] sm:$0xf0] }
  0x2d   : > { %1466 = vmatpush.bf16.msrb.mxu2 %v2488_v36  ;;  %1387 = vmatmul.bf16.vlgmr.msra.gmra.mxu3 %v1810_v41  ;;  %v2405_v36 = vld [vmem:[%s2684_s14 + $0x9c] sm:$0xf0]  ;;  %v1949_v41 = vld [vmem:[%s2684_s14 + $0x128] sm:$0xf]  ;;  %v2400_v20 = vld [vmem:[%s2684_s14 + $0x7c] sm:$0xf] }
  0x2e   : > { %1495 = vmatpush.bf16.msrb.mxu3 %v2496_v37  ;;  %1358 = vmatmul.bf16.vlgmr.msra.gmra.mxu2 %v1806_v40  ;;  %v2502_v37 = vld [vmem:[%s3113_s1 + $0x228] sm:$0xff]  ;;  %v1862_v40 = vor.u32 %v2405_v36, %v1861_v35  ;;  %v1917_v35 = vld [vmem:[%s2684_s14 + $0xd8] sm:$0xf] }
  0x2f   : > { %v1871_v21 = vld [vmem:[%s2684_s14 + $0xa8] sm:$0xf0]  ;;  %v2418_v36 = vld [vmem:[%s2684_s14 + $0x104] sm:$0xf0] }
  0x30   : > { %1322 = vmatpush.bf16.msrb.mxu1 %v2447_v38  ;;  %1409 = vmatpush.bf16.msrb.mxu0 %v2471_v39  ;;  %v2475_v38 = vld [vmem:[%s3113_s1 + $0x150] sm:$0xff]  ;;  %v1850_v39 = vor.u32 %v2397_v33, %v1847_v34 }
  0x31   : > { %1467 = vmatpush.bf16.msrb.mxu2 %v2487_v42  ;;  %v2428_v42 = vld [vmem:[%s2684_s14 + $0x154] sm:$0xf0] }
  0x32   : > { %1496 = vmatpush.bf16.msrb.mxu3 %v2495_v45  ;;  %v1950_v45 = vor.u32 %v2428_v42, %v1949_v41  ;;  %v2508_v42 = vld [vmem:[%s3113_s1 + $0x258] sm:$0xff] }
  0x34   : > { %1323 = vmatpush.bf16.msrb.mxu1 %v2446_v43  ;;  %1410 = vmatpush.bf16.msrb.mxu0 %v2470_v44  ;;  %v2422_v43 = vld [vmem:[%s2684_s14 + $0x12c] sm:$0xf]  ;;  %v1951_v44 = vld [vmem:[%s2684_s14 + $0x158] sm:$0xf0] }
  0x35   : > { %1468 = vmatpush.bf16.msrb.mxu2 %v2486_v46  ;;  %v2481_v46 = vld [vmem:[%s3113_s1 + $0x180] sm:$0xff] }
  0x36   : > { %1497 = vmatpush.bf16.msrb.mxu3 %v2494_v47  ;;  %v1954_v47 = vor.u32 %v2422_v43, %v1951_v44  ;;  %v2515_v43 = vld [vmem:[%s3113_s1 + $0x290] sm:$0xff] }
  0x37   : > { %v2523_v44 = vld [vmem:[%s3113_s1 + $0x2d0] sm:$0xff] }
  0x38   : > { %1324 = vmatpush.bf16.msrb.mxu1 %v2445_v48  ;;  %1411 = vmatpush.bf16.msrb.mxu0 %v2469_v49  ;;  %v2474_v48 = vld [vmem:[%s3113_s1 + $0x148] sm:$0xff]  ;;  %v2489_v49 = vld [vmem:[%s3113_s1 + $0x1c0] sm:$0xff] }
  0x39   : > { %1469 = vmatpush.bf16.msrb.mxu2 %v2485_v2  ;;  %v1823_v2 = vld [vmem:[%s2684_s14 + $0x48] sm:$0xf0] }
  0x3a   : > { %1498 = vmatpush.bf16.msrb.mxu3 %v2493_v5  ;;  %v2512_v5 = vld [vmem:[%s3113_s1 + $0x278] sm:$0xff] }
  0x3b   : > { %1315 = vmatmul.bf16.gmra.mxu1 %v1942_v57  ;;  %1305 = vmatmul.bf16.gmra.mxu0 %v1846_v58  ;;  %v1895_v57 = vld [vmem:[%s2684_s14 + $0xf0] sm:$0xf0]  ;;  %v1909_v58 = vld [vmem:[%s2684_s14 + $0xd0] sm:$0xf] }
  0x3c   : > { %1325 = vmatpush.bf16.msrb.mxu1 %v2444_v54  ;;  %1412 = vmatpush.bf16.msrb.mxu0 %v2468_v55  ;;  %v2528_v54 = vld [vmem:[%s3113_s1 + $0x2f8] sm:$0xff]  ;;  %v2499_v55 = vld [vmem:[%s3113_s1 + $0x210] sm:$0xff]  ;;  %v1898_v61 = vor.u32 %v2409_v56, %v1895_v57  ;;  %v1967_v56 = vld [vmem:[%s2684_s14 + $0x168] sm:$0xf0] }
  0x3d   : > { %1392 = vmatmul.bf16.gmra.mxu3 %v1858_v1  ;;  %1470 = vmatpush.bf16.msrb.mxu2 %v2484_v6  ;;  %v2388_v1 = vld [vmem:[%s2684_s14 + $0x1c] sm:$0xf]  ;;  %v2497_v6 = vld [vmem:[%s3113_s1 + $0x200] sm:$0xff]  ;;  %v2522_v57 = vld [vmem:[%s3113_s1 + $0x2c8] sm:$0xff] }
  0x3e   : > { %1363 = vmatmul.bf16.gmra.mxu2 %v1854_v0  ;;  %1499 = vmatpush.bf16.msrb.mxu3 %v2492_v7  ;;  %v2394_v0 = vld [vmem:[%s2684_s14 + $0x44] sm:$0xf0]  ;;  %v2519_v7 = vld [vmem:[%s3113_s1 + $0x2b0] sm:$0xff] }
  0x40   : > { %1326 = vmatpush.bf16.msrb.mxu1 %v2443_v62  ;;  %1413 = vmatpush.bf16.msrb.mxu0 %v2467_v63  ;;  %v1910_v62 = vor.u32 %v2417_v59, %v1909_v58  ;;  %v1821_v63 = vld [vmem:[%s2684_s14 + $0x18] sm:$0xf]  ;;  %v2513_v59 = vld [vmem:[%s3113_s1 + $0x280] sm:$0xff] }
  0x41   : > { %1471 = vmatpush.bf16.msrb.mxu2 %v2483_v25  ;;  %v2517_v25 = vld [vmem:[%s3113_s1 + $0x2a0] sm:$0xff] }
  0x42   : > { %1500 = vmatpush.bf16.msrb.mxu3 %v2491_v26  ;;  %v2525_v26 = vld [vmem:[%s3113_s1 + $0x2e0] sm:$0xff] }
  0x44   : > { %1327 = vmatpush.bf16.msrb.mxu1 %v2442_v3  ;;  %1414 = vmatpush.bf16.msrb.mxu0 %v2466_v4  ;;  %v1822_v3 = vor.u32 %v2394_v0, %v1821_v63  ;;  %v1826_v4 = vor.u32 %v2388_v1, %v1823_v2  ;;  %v2505_v63 = vld [vmem:[%s3113_s1 + $0x240] sm:$0xff]  ;;  %v2411_v0 = vld [vmem:[%s2684_s14 + $0xd4] sm:$0xf] }
  0x45   : > { %1472 = vmatpush.bf16.msrb.mxu2 %v2482_v29  ;;  %v2387_v29 = vld [vmem:[%s2684_s14 + $0x14] sm:$0xf]  ;;  %v1911_v1 = vld [vmem:[%s2684_s14 + $0x100] sm:$0xf0]  ;;  %v1925_v2 = vld [vmem:[%s2684_s14 + $0xe0] sm:$0xf] }
  0x46   : > { %1501 = vmatpush.bf16.msrb.mxu3 %v2490_v31  ;;  %v1829_v31 = vld [vmem:[%s2684_s14 + $0x20] sm:$0xf] }
  0x48   : > { %1328 = vmatpush.bf16.msrb.mxu1 %v2441_v8  ;;  %1415 = vmatpush.bf16.msrb.mxu0 %v2465_v9  ;;  %v2527_v8 = vld [vmem:[%s3113_s1 + $0x2f0] sm:$0xff] }
  0x49   : > { %1473 = vmatpush.bf16.msrb.mxu2 %v2481_v46  ;;  %v2511_v9 = vld [vmem:[%s3113_s1 + $0x270] sm:$0xff]  ;;  %v2514_v46 = vld [vmem:[%s3113_s1 + $0x288] sm:$0xff] }
  0x4a   : > { %1502 = vmatpush.bf16.msrb.mxu3 %v2489_v49  ;;  %v1877_v49 = vld [vmem:[%s2684_s14 + $0x80] sm:$0xf] }
  0x4b   : > { %1329 = vmatmul.bf16.vlgmr.msrb.gmra.mxu1 %v1802_v16  ;;  %1416 = vmatmul.bf16.vlgmr.msrb.gmra.mxu0 %v1814_v17  ;;  %v1946_v16 = vor.u32 %v2421_v12, %v1943_v13 }
  0x4c   : > { %1437 = vmatpush.bf16.msra.mxu1 %v2480_v10  ;;  %1524 = vmatpush.bf16.msra.mxu0 %v2504_v28  ;;  %v2518_v10 = vld [vmem:[%s3113_s1 + $0x2a8] sm:$0xff]  ;;  %v2516_v28 = vld [vmem:[%s3113_s1 + $0x298] sm:$0xff] }
  0x4d   : > { %1397 = vmatmul.bf16.gmra.mxu3 %v1906_v24  ;;  %1582 = vmatpush.bf16.msra.mxu2 %v2520_v53  ;;  %v2510_v24 = vld [vmem:[%s3113_s1 + $0x268] sm:$0xff]  ;;  %v1965_v53 = vld [vmem:[%s2684_s14 + $0x138] sm:$0xf] }
  0x4e   : > { %1368 = vmatmul.bf16.gmra.mxu2 %v1902_v23  ;;  %1611 = vmatpush.bf16.msra.mxu3 %v2528_v54  ;;  %v1874_v23 = vor.u32 %v2400_v20, %v1871_v21  ;;  %v2430_v54 = vld [vmem:[%s2684_s14 + $0x164] sm:$0xf0]  ;;  %v1973_v20 = vld [vmem:[%s2684_s14 + $0x140] sm:$0xf]  ;;  %v2431_v21 = vld [vmem:[%s2684_s14 + $0x16c] sm:$0xf0] }
  0x4f   : > { %v1966_v58 = vor.u32 %v2430_v54, %v1965_v53 }
  0x50   : > { %1438 = vmatpush.bf16.msra.mxu1 %v2479_v15  ;;  %1525 = vmatpush.bf16.msra.mxu0 %v2503_v30  ;;  %v2429_v15 = vld [vmem:[%s2684_s14 + $0x15c] sm:$0xf0]  ;;  %v1815_v30 = vld [vmem:[%s2684_s14 + $0x40] sm:$0xf0] }
  0x51   : > { %1583 = vmatpush.bf16.msra.mxu2 %v2519_v7  ;;  %v1958_v17 = vor.u32 %v2429_v15, %v1957_v14  ;;  %v1818_v33 = vor.u32 %v2387_v29, %v1815_v30  ;;  %v2396_v7 = vld [vmem:[%s2684_s14 + $0x54] sm:$0xf0]  ;;  %v1887_v29 = vld [vmem:[%s2684_s14 + $0xb8] sm:$0xf0] }
  0x52   : > { %1612 = vmatpush.bf16.msra.mxu3 %v2527_v8 }
  0x54   : > { %1439 = vmatpush.bf16.msra.mxu1 %v2478_v22  ;;  %1526 = vmatpush.bf16.msra.mxu0 %v2502_v37  ;;  %v1870_v22 = vor.u32 %v2406_v19, %v1869_v18  ;;  %v2412_v37 = vld [vmem:[%s2684_s14 + $0xdc] sm:$0xf]  ;;  %v2423_v18 = vld [vmem:[%s2684_s14 + $0x134] sm:$0xf]  ;;  %v1959_v19 = vld [vmem:[%s2684_s14 + $0x160] sm:$0xf0] }
  0x55   : > { %1584 = vmatpush.bf16.msra.mxu2 %v2518_v10  ;;  %v2390_v10 = vld [vmem:[%s2684_s14 + $0x2c] sm:$0xf] }
  0x56   : > { %1613 = vmatpush.bf16.msra.mxu3 %v2526_v11  ;;  %v1839_v11 = vld [vmem:[%s2684_s14 + $0x58] sm:$0xf0] }
  0x57   : > { %v1842_v13 = vor.u32 %v2390_v10, %v1839_v11  ;;  %v2426_v10 = vld [vmem:[%s2684_s14 + $0x14c] sm:$0xf]  ;;  %v1983_v11 = vld [vmem:[%s2684_s14 + $0x178] sm:$0xf0] }
  0x58   : > { %1440 = vmatpush.bf16.msra.mxu1 %v2477_v27  ;;  %1527 = vmatpush.bf16.msra.mxu0 %v2501_v50  ;;  %v2509_v27 = vld [vmem:[%s3113_s1 + $0x260] sm:$0xff]  ;;  %v2407_v50 = vld [vmem:[%s2684_s14 + $0xac] sm:$0xf0] }
  0x59   : > { %1585 = vmatpush.bf16.msra.mxu2 %v2517_v25  ;;  %v2408_v25 = vld [vmem:[%s2684_s14 + $0xb4] sm:$0xf0] }
  0x5a   : > { %1614 = vmatpush.bf16.msra.mxu3 %v2525_v26 }
  0x5b   : > { %1334 = vmatmul.bf16.gmra.mxu1 %v1850_v39  ;;  %1421 = vmatmul.bf16.gmra.mxu0 %v1862_v40  ;;  %v2524_v39 = vld [vmem:[%s3113_s1 + $0x2d8] sm:$0xff]  ;;  %v1918_v40 = vor.u32 %v2418_v36, %v1917_v35 }
  0x5c   : > { %1441 = vmatpush.bf16.msra.mxu1 %v2476_v32  ;;  %1528 = vmatpush.bf16.msra.mxu0 %v2500_v51  ;;  %v2395_v32 = vld [vmem:[%s2684_s14 + $0x4c] sm:$0xf0] }
  0x5d   : > { %1402 = vmatmul.bf16.gmra.mxu3 %v1954_v47  ;;  %1586 = vmatpush.bf16.msra.mxu2 %v2516_v28  ;;  %v1830_v34 = vor.u32 %v2395_v32, %v1829_v31  ;;  %v2399_v47 = vld [vmem:[%s2684_s14 + $0x74] sm:$0xf]  ;;  %v2402_v28 = vld [vmem:[%s2684_s14 + $0x8c] sm:$0xf] }
  0x5e   : > { %1373 = vmatmul.bf16.gmra.mxu2 %v1950_v45  ;;  %1615 = vmatpush.bf16.msra.mxu3 %v2524_v39  ;;  %v2507_v45 = vld [vmem:[%s3113_s1 + $0x250] sm:$0xff]  ;;  %v2389_v39 = vld [vmem:[%s2684_s14 + $0x24] sm:$0xf] }
  0x60   : > { %1442 = vmatpush.bf16.msra.mxu1 %v2475_v38  ;;  %1529 = vmatpush.bf16.msra.mxu0 %v2499_v55  ;;  %v1919_v38 = vld [vmem:[%s2684_s14 + $0x108] sm:$0xf0]  ;;  %v2424_v55 = vld [vmem:[%s2684_s14 + $0x13c] sm:$0xf] }
  0x61   : > { %v1922_v41 = vor.u32 %v2412_v37, %v1919_v38  ;;  %1587 = vmatpush.bf16.msra.mxu2 %v2515_v43  ;;  %v3008_v38 = vld [vmem:[%s3114_s2] ss:$0 sm:$0xff]  ;;  %v1933_v43 = vld [vmem:[%s2684_s14 + $0xe8] sm:$0xf] }
  0x62   : > { %1616 = vmatpush.bf16.msra.mxu3 %v2523_v44  ;;  %v2420_v44 = vld [vmem:[%s2684_s14 + $0x114] sm:$0xf0] }
  0x64   : > { %1443 = vmatpush.bf16.msra.mxu1 %v2474_v48  ;;  %1530 = vmatpush.bf16.msra.mxu0 %v2498_v60  ;;  %v1863_v48 = vld [vmem:[%s2684_s14 + $0xa0] sm:$0xf0]  ;;  %v1970_v60 = vor.u32 %v2424_v55, %v1967_v56 }
  0x65   : > { %1588 = vmatpush.bf16.msra.mxu2 %v2514_v46  ;;  %v1866_v51 = vor.u32 %v2399_v47, %v1863_v48  ;;  %v2414_v47 = vld [vmem:[%s2684_s14 + $0xec] sm:$0xf]  ;;  %v1935_v48 = vld [vmem:[%s2684_s14 + $0x118] sm:$0xf0] }
  0x66   : > { %1617 = vmatpush.bf16.msra.mxu3 %v2522_v57  ;;  %v1938_v54 = vor.u32 %v2414_v47, %v1935_v48 }
  0x68   : > { %1444 = vmatpush.bf16.msra.mxu1 %v2473_v52  ;;  %1531 = vmatpush.bf16.msra.mxu0 %v2497_v6  ;;  %v1878_v52 = vor.u32 %v2407_v50, %v1877_v49  ;;  %v1837_v6 = vld [vmem:[%s2684_s14 + $0x28] sm:$0xf] }
  0x69   : > { %1589 = vmatpush.bf16.msra.mxu2 %v2513_v59  ;;  %v1838_v12 = vor.u32 %v2396_v7, %v1837_v6  ;;  %v2432_v6 = vld [vmem:[%s2684_s14 + $0x174] sm:$0xf0] }
  0x6b   : > { %1339 = vmatmul.bf16.gmra.mxu1 %v1898_v61  ;;  %1426 = vmatmul.bf16.gmra.mxu0 %v1910_v62  ;;  %v2506_v61 = vld [vmem:[%s3113_s1 + $0x248] sm:$0xff]  ;;  %v2521_v62 = vld [vmem:[%s3113_s1 + $0x2c0] sm:$0xff] }
  0x6c   : > { %1553 = vmatpush.bf16.msrb.mxu1 %v2512_v5  ;;  %1618 = vmatpush.bf16.msra.mxu3 %v2521_v62 }
  0x6d   : > { %1503 = vmatmul.bf16.vlgmr.msrb.gmra.mxu3 %v1826_v4  ;;  %v1914_v4 = vor.u32 %v2411_v0, %v1911_v1  ;;  %v2401_v0 = vld [vmem:[%s2684_s14 + $0x84] sm:$0xf]  ;;  %v1879_v1 = vld [vmem:[%s2684_s14 + $0xb0] sm:$0xf0] }
  0x6e   : > { %1474 = vmatmul.bf16.vlgmr.msrb.gmra.mxu2 %v1822_v3  ;;  %v2419_v3 = vld [vmem:[%s2684_s14 + $0x10c] sm:$0xf0] }
  0x6f   : > { %v1926_v5 = vor.u32 %v2419_v3, %v1925_v2 }
  0x70   : > { %1554 = vmatpush.bf16.msrb.mxu1 %v2511_v9 }
  0x74   : > { %1555 = vmatpush.bf16.msrb.mxu1 %v2510_v24  ;;  %v1885_v24 = vld [vmem:[%s2684_s14 + $0x88] sm:$0xf] }
  0x75   : > { %v1886_v32 = vor.u32 %v2408_v25, %v1885_v24 }
  0x78   : > { %1556 = vmatpush.bf16.msrb.mxu1 %v2509_v27 }
  0x7b   : > { %1344 = vmatmul.bf16.gmra.mxu1 %v1946_v16  ;;  %1431 = vmatmul.bf16.gmra.mxu0 %v1958_v17 }
  0x7c   : > { %1557 = vmatpush.bf16.msrb.mxu1 %v2508_v42 }
  0x7d   : > { %1508 = vmatmul.bf16.gmra.mxu3 %v1874_v23  ;;  %v1974_v23 = vor.u32 %v2431_v21, %v1973_v20 }
  0x7e   : > { %1479 = vmatmul.bf16.gmra.mxu2 %v1870_v22  ;;  %v1962_v22 = vor.u32 %v2423_v18, %v1959_v19  ;;  %v1986_v18 = vor.u32 %v2426_v10, %v1983_v11 }
  0x80   : > { %1558 = vmatpush.bf16.msrb.mxu1 %v2507_v45 }
  0x84   : > { %1559 = vmatpush.bf16.msrb.mxu1 %v2506_v61 }
  0x88   : > { %1560 = vmatpush.bf16.msrb.mxu1 %v2505_v63 }
  0x8b   : > { %1445 = vmatmul.bf16.vlgmr.msra.gmra.mxu1 %v1818_v33  ;;  %1532 = vmatmul.bf16.vlgmr.msra.gmra.mxu0 %v1830_v34  ;;  %v1890_v33 = vor.u32 %v2402_v28, %v1887_v29  ;;  %v2413_v29 = vld [vmem:[%s2684_s14 + $0xe4] sm:$0xf] }
  0x8d   : > { %1513 = vmatmul.bf16.gmra.mxu3 %v1922_v41 }
  0x8e   : > { %1484 = vmatmul.bf16.gmra.mxu2 %v1918_v40  ;;  %v1831_v40 = vld [vmem:[%s2684_s14 + $0x50] sm:$0xf0] }
  0x8f   : > { %v1834_v42 = vor.u32 %v2389_v39, %v1831_v40 }
  0x9b   : > { %1450 = vmatmul.bf16.gmra.mxu1 %v1866_v51  ;;  %1537 = vmatmul.bf16.gmra.mxu0 %v1878_v52  ;;  %v1934_v52 = vor.u32 %v2420_v44, %v1933_v43 }
  0x9d   : > { %1518 = vmatmul.bf16.gmra.mxu3 %v1970_v60 }
  0x9e   : > { %1489 = vmatmul.bf16.gmra.mxu2 %v1966_v58 }
  0xa8   : > { %v2987_v8 = vpop.f32.mrf.mxu1  ;;  %v1301_v9 = vpop.f32.mrf.mxu0 }
  0xa9   : > { %v1302_v41 = vadd.f32 %v3008_v38, %v1301_v9 }
  0xab   : > { %1455 = vmatmul.bf16.gmra.mxu1 %v1914_v4  ;;  %1542 = vmatmul.bf16.gmra.mxu0 %v1926_v5  ;;  %v1882_v4 = vor.u32 %v2401_v0, %v1879_v1  ;;  %v1981_v5 = vld [vmem:[%s2684_s14 + $0x148] sm:$0xf] }
  0xad   : > { %1619 = vmatmul.bf16.vlgmr.msra.gmra.mxu3 %v1842_v13 }
  0xae   : > { %1590 = vmatmul.bf16.vlgmr.msra.gmra.mxu2 %v1838_v12 }
  0xb0   : > { %v2991_v14 = vpop.f32.mrf.mxu1  ;;  %v1303_v15 = vpop.f32.mrf.mxu0 }
  0xb1   : > { %v1359_v16 = vpop.f32.mrf.mxu2  ;;  %v1388_v17 = vpop.f32.mrf.mxu3  ;;  %v1304_v55 = vadd.f32 %v3008_v38, %v1303_v15  ;;  %v1314_v43 = vadd.f32 %v3008_v38, %v2991_v14 }
  0xb8   : > { %v2999_v26 = vpop.f32.mrf.mxu1  ;;  %v1306_v27 = vpop.f32.mrf.mxu0 }
  0xb9   : > { %v1361_v30 = vpop.f32.mrf.mxu2  ;;  %v1390_v31 = vpop.f32.mrf.mxu3  ;;  %v1307_v2 = vadd.f32 %v3008_v38, %v1306_v27 }
  0xbb   : > { %1460 = vmatmul.bf16.gmra.mxu1 %v1962_v22  ;;  %1547 = vmatmul.bf16.gmra.mxu0 %v1974_v23 }
  0xbd   : > { %1624 = vmatmul.bf16.gmra.mxu3 %v1890_v33 }
  0xbe   : > { %1595 = vmatmul.bf16.gmra.mxu2 %v1886_v32  ;;  %v1312_v32 = vadd.f32 %v3008_v38, %v2987_v8 }
  0xc0   : > { %v3003_v34 = vpop.f32.mrf.mxu1  ;;  %v1308_v35 = vpop.f32.mrf.mxu0 }
  0xc1   : > { %v1364_v36 = vpop.f32.mrf.mxu2  ;;  %v1393_v37 = vpop.f32.mrf.mxu3  ;;  %v1309_v19 = vadd.f32 %v3008_v38, %v1308_v35 }
  0xc8   : > { %v1330_v45 = vpop.f32.mrf.mxu1  ;;  %v1417_v46 = vpop.f32.mrf.mxu0 }
  0xc9   : > { %v1331_v49 = vadd.f32 %v1330_v45, %v1302_v41  ;;  %v1366_v50 = vpop.f32.mrf.mxu2  ;;  %v1395_v51 = vpop.f32.mrf.mxu3 }
  0xcb   : > { %v1360_v53 = vadd.f32 %v1359_v16, %v1331_v49  ;;  %1561 = vmatmul.bf16.vlgmr.msrb.gmra.mxu1 %v1834_v42  ;;  %v1982_v16 = vor.u32 %v2432_v6, %v1981_v5 }
  0xcd   : > { %v1389_v56 = vadd.f32 %v1388_v17, %v1360_v53  ;;  %1629 = vmatmul.bf16.gmra.mxu3 %v1938_v54  ;;  %v1317_v53 = vadd.f32 %v3008_v38, %v2999_v26 }
  0xce   : > { %1600 = vmatmul.bf16.gmra.mxu2 %v1934_v52 }
  0xcf   : > { %v3018_v57 = vadd.f32 %v1417_v46, %v1389_v56 }
  0xd0   : > { %v1332_v58 = vpop.f32.mrf.mxu1  ;;  %v3020_v59 = vpop.f32.mrf.mxu0 }
  0xd1   : > { %v1333_v60 = vadd.f32 %v1332_v58, %v1304_v55  ;;  %v1369_v61 = vpop.f32.mrf.mxu2  ;;  %v1398_v62 = vpop.f32.mrf.mxu3 }
  0xd3   : > { %v1362_v63 = vadd.f32 %v1361_v30, %v1333_v60  ;;  %v1927_v30 = vld [vmem:[%s2684_s14 + $0x110] sm:$0xf0] }
  0xd4   : > { %v1930_v33 = vor.u32 %v2413_v29, %v1927_v30 }
  0xd5   : > { %v3025_v3 = vadd.f32 %v1390_v31, %v1362_v63  ;;  %v1319_v63 = vadd.f32 %v3008_v38, %v3003_v34  ;;  %v2530_v34 = vld [vmem:[%s3115_s3 + $0x8] sm:$0xff] }
  0xd6   : > { %1691 = vmatpush.bf16.msrb.mxu0 %v2530_v34  ;;  %2562 = vmatpush.bf16.msrb.mxu2 %v2530_v34 }
  0xd8   : > { %v1335_v7 = vpop.f32.mrf.mxu1  ;;  %v1422_v9 = vpop.f32.mrf.mxu0 }
  0xd9   : > { %v1336_v12 = vadd.f32 %v1335_v7, %v1307_v2  ;;  %v1371_v13 = vpop.f32.mrf.mxu2  ;;  %v1400_v15 = vpop.f32.mrf.mxu3 }
  0xdb   : > { %v1365_v17 = vadd.f32 %v1364_v36, %v1336_v12  ;;  %1566 = vmatmul.bf16.gmra.mxu1 %v1882_v4 }
  0xdd   : > { %v1394_v20 = vadd.f32 %v1393_v37, %v1365_v17  ;;  %1634 = vmatmul.bf16.gmra.mxu3 %v1986_v18 }
  0xde   : > { %1605 = vmatmul.bf16.gmra.mxu2 %v1982_v16 }
  0xdf   : > { %v3032_v21 = vadd.f32 %v1422_v9, %v1394_v20 }
  0xe0   : > { %v1337_v22 = vpop.f32.mrf.mxu1  ;;  %v3034_v23 = vpop.f32.mrf.mxu0 }
  0xe1   : > { %v1338_v24 = vadd.f32 %v1337_v22, %v1309_v19  ;;  %v1374_v25 = vpop.f32.mrf.mxu2  ;;  %v1403_v27 = vpop.f32.mrf.mxu3 }
  0xe3   : > { %v1367_v28 = vadd.f32 %v1366_v50, %v1338_v24  ;;  %v2425_v50 = vld [vmem:[%s2684_s14 + $0x144] sm:$0xf] }
  0xe5   : > { %v3038_v31 = vadd.f32 %v1395_v51, %v1367_v28  ;;  %v1975_v51 = vld [vmem:[%s2684_s14 + $0x170] sm:$0xf0] }
  0xe6   : > { %v1978_v54 = vor.u32 %v2425_v50, %v1975_v51 }
  0xe8   : > { %v1340_v35 = vpop.f32.mrf.mxu1  ;;  %v1427_v36 = vpop.f32.mrf.mxu0 }
  0xe9   : > { %v1341_v37 = vadd.f32 %v1340_v35, %v1312_v32  ;;  %v1376_v39 = vpop.f32.mrf.mxu2  ;;  %v1405_v40 = vpop.f32.mrf.mxu3 }
  0xeb   : > { %v1370_v41 = vadd.f32 %v1369_v61, %v1341_v37  ;;  %1571 = vmatmul.bf16.gmra.mxu1 %v1930_v33 }
  0xed   : > { %v1399_v42 = vadd.f32 %v1398_v62, %v1370_v41 }
  0xef   : > { %v1428_v44 = vadd.f32 %v1427_v36, %v1399_v42 }
  0xf0   : > { %v1342_v45 = vpop.f32.mrf.mxu1  ;;  %v3044_v48 = vpop.f32.mrf.mxu0 }
  0xf1   : > { %v1343_v46 = vadd.f32 %v1342_v45, %v1314_v43  ;;  %v1475_v47 = vpop.f32.mrf.mxu2  ;;  %v1504_v8 = vpop.f32.mrf.mxu3 }
  0xf3   : > { %v1372_v49 = vadd.f32 %v1371_v13, %v1343_v46 }
  0xf5   : > { %v3048_v52 = vadd.f32 %v1400_v15, %v1372_v49 }
  0xf8   : > { %v1345_v55 = vpop.f32.mrf.mxu1  ;;  %v1432_v61 = vpop.f32.mrf.mxu0 }
  0xf9   : > { %v1346_v56 = vadd.f32 %v1345_v55, %v1317_v53  ;;  %v1477_v58 = vpop.f32.mrf.mxu2  ;;  %v1506_v14 = vpop.f32.mrf.mxu3 }
  0xfb   : > { %v1375_v60 = vadd.f32 %v1374_v25, %v1346_v56  ;;  %1576 = vmatmul.bf16.gmra.mxu1 %v1978_v54 }
  0xfd   : > { %v1404_v62 = vadd.f32 %v1403_v27, %v1375_v60 }
  0xff   : > { %v1433_v0 = vadd.f32 %v1432_v61, %v1404_v62 }
 0x100   : > { %v1347_v1 = vpop.f32.mrf.mxu1  ;;  %v3067_v32 = vpop.f32.mrf.mxu0 }
 0x101   : > { %v1348_v2 = vadd.f32 %v1347_v1, %v1319_v63  ;;  %v1480_v4 = vpop.f32.mrf.mxu2  ;;  %v1509_v5 = vpop.f32.mrf.mxu3 }
 0x103   : > { %v1377_v6 = vadd.f32 %v1376_v39, %v1348_v2  ;;  %v2529_v39 = vld [vmem:[%s3115_s3] sm:$0xff]  ;;  %v1425_v2 = vadd.f32 %v3034_v23, %v3038_v31 }
 0x104   : > { %1692 = vmatpush.bf16.msrb.mxu0 %v2529_v39  ;;  %2563 = vmatpush.bf16.msrb.mxu2 %v2529_v39 }
 0x105   : > { %v3054_v7 = vadd.f32 %v1405_v40, %v1377_v6 }
 0x108   : > { %v1446_v26 = vpop.f32.mrf.mxu1  ;;  %v1533_v37 = vpop.f32.mrf.mxu0 }
 0x109   : > { %v1447_v9 = vadd.f32 %v1446_v26, %v3018_v57  ;;  %v1482_v10 = vpop.f32.mrf.mxu2  ;;  %v3057_v12 = vpop.f32.mrf.mxu3 }
 0x10b   : > { %v1476_v11 = vadd.f32 %v1475_v47, %v1447_v9 }
 0x10d   : > { %v1505_v13 = vadd.f32 %v1504_v8, %v1476_v11  ;;  %v1420_v8 = vadd.f32 %v3020_v59, %v3025_v3 }
 0x10f   : > { %v1534_v55 = vadd.f32 %v1533_v37, %v1505_v13 }
 0x110   : > { %v1448_v15 = vpop.f32.mrf.mxu1  ;;  %v1535_v46 = vpop.f32.mrf.mxu0 }
 0x111   : > { %v1485_v38 = vpop.f32.mrf.mxu2  ;;  %v1514_v16 = vpop.f32.mrf.mxu3  ;;  %v1449_v49 = vadd.f32 %v1448_v15, %v1420_v8 }
 0x113   : > { %v1478_v51 = vadd.f32 %v1477_v58, %v1449_v49 }
 0x115   : > { %v1507_v60 = vadd.f32 %v1506_v14, %v1478_v51 }
 0x117   : > { %v1536_v62 = vadd.f32 %v1535_v46, %v1507_v60 }
 0x118   : > { %v1451_v17 = vpop.f32.mrf.mxu1  ;;  %v1538_v56 = vpop.f32.mrf.mxu0 }
 0x119   : > { %v1452_v18 = vadd.f32 %v1451_v17, %v3032_v21  ;;  %v3063_v57 = vpop.f32.mrf.mxu2  ;;  %v3065_v24 = vpop.f32.mrf.mxu3 }
 0x11b   : > { %v1481_v19 = vadd.f32 %v1480_v4, %v1452_v18 }
 0x11d   : > { %v1510_v20 = vadd.f32 %v1509_v5, %v1481_v19 }
 0x11f   : > { %v1539_v14 = vadd.f32 %v1538_v56, %v1510_v20 }
 0x120   : > { %v1453_v22 = vpop.f32.mrf.mxu1  ;;  %v1540_v26 = vpop.f32.mrf.mxu0 }
 0x121   : > { %v1490_v27 = vpop.f32.mrf.mxu2  ;;  %v1519_v29 = vpop.f32.mrf.mxu3  ;;  %v1454_v6 = vadd.f32 %v1453_v22, %v1425_v2 }
 0x123   : > { %v1483_v9 = vadd.f32 %v1482_v10, %v1454_v6  ;;  %v1430_v10 = vadd.f32 %v3044_v48, %v3048_v52 }
 0x128   : > { %v1456_v25 = vpop.f32.mrf.mxu1  ;;  %v1543_v31 = vpop.f32.mrf.mxu0 }
 0x129   : > { %v1457_v28 = vadd.f32 %v1456_v25, %v1428_v44  ;;  %v3071_v36 = vpop.f32.mrf.mxu2  ;;  %v3073_v21 = vpop.f32.mrf.mxu3 }
 0x12b   : > { %v1486_v30 = vadd.f32 %v1485_v38, %v1457_v28 }
 0x12d   : > { %v3069_v33 = vadd.f32 %v1514_v16, %v1486_v30  ;;  %v1512_v16 = vadd.f32 %v3057_v12, %v1483_v9 }
 0x12f   : > { %v1541_v18 = vadd.f32 %v1540_v26, %v1512_v16 }
 0x130   : > { %v1458_v35 = vpop.f32.mrf.mxu1 }
 0x131   : > { %v1591_v43 = vpop.f32.mrf.mxu2  ;;  %v1620_v45 = vpop.f32.mrf.mxu3 }
 0x138   : > { %v1461_v40 = vpop.f32.mrf.mxu1 }
 0x139   : > { %v1462_v41 = vadd.f32 %v1461_v40, %v1433_v0  ;;  %v1593_v50 = vpop.f32.mrf.mxu2  ;;  %v1622_v54 = vpop.f32.mrf.mxu3 }
 0x13b   : > { %v1491_v42 = vadd.f32 %v1490_v27, %v1462_v41  ;;  %v1459_v27 = vadd.f32 %v1458_v35, %v1430_v10  ;;  %v1545_v41 = vpop.f32.mrf.mxu0 }
 0x13d   : > { %v3078_v44 = vadd.f32 %v1519_v29, %v1491_v42  ;;  %v1488_v12 = vadd.f32 %v3063_v57, %v1459_v27  ;;  %v1435_v57 = vadd.f32 %v3067_v32, %v3054_v7 }
 0x13f   : > { %v1517_v46 = vadd.f32 %v3065_v24, %v1488_v12 }
 0x140   : > { %v3080_v47 = vpop.f32.mrf.mxu1 }
 0x141   : > { %v1596_v1 = vpop.f32.mrf.mxu2  ;;  %v1625_v5 = vpop.f32.mrf.mxu3  ;;  %v1546_v52 = vadd.f32 %v1545_v41, %v1517_v46 }
 0x148   : > { %v1562_v53 = vpop.f32.mrf.mxu1 }
 0x149   : > { %v1563_v61 = vadd.f32 %v1562_v53, %v1534_v55  ;;  %v1598_v38 = vpop.f32.mrf.mxu2  ;;  %v1627_v23 = vpop.f32.mrf.mxu3 }
 0x14a   : > { %v1548_v53 = vpop.f32.mrf.mxu0 }
 0x14b   : > { %v1592_v63 = vadd.f32 %v1591_v43, %v1563_v61  ;;  %v1544_v43 = vadd.f32 %v1543_v31, %v3069_v33 }
 0x14d   : > { %v1621_v59 = vadd.f32 %v1620_v45, %v1592_v63 }
 0x14f   : > { %v1640_v11 = vmax.f32 %v1621_v59, 0.0 }
 0x150   : > { %v1564_v0 = vpop.f32.mrf.mxu1 }
 0x151   : > { %v1565_v4 = vadd.f32 %v1564_v0, %v1536_v62  ;;  %v1601_v20 = vpop.f32.mrf.mxu2  ;;  %v1630_v37 = vpop.f32.mrf.mxu3  ;;  %v1549_v0 = vadd.f32 %v1548_v53, %v3078_v44 }
 0x152   : > { %v1550_v32 = vpop.f32.mrf.mxu0 }
 0x153   : > { %v1594_v3 = vadd.f32 %v1593_v50, %v1565_v4 }
 0x155   : > { %v1623_v58 = vadd.f32 %v1622_v54, %v1594_v3  ;;  %v1464_v54 = vadd.f32 %v3080_v47, %v1435_v57 }
 0x157   : > { %v1641_v13 = vmax.f32 %v1623_v58, 0.0  ;;  %v1493_v24 = vadd.f32 %v3071_v36, %v1464_v54 }
 0x158   : > { %v1567_v15 = vpop.f32.mrf.mxu1 }
 0x159   : > { %v1648_v34 = vpack.c.bf16 %v1641_v13, %v1640_v11  ;;  %v1568_v17 = vadd.f32 %v1567_v15, %v1539_v14  ;;  %v1603_v48 = vpop.f32.mrf.mxu2  ;;  %v1632_v49 = vpop.f32.mrf.mxu3  ;;  %v1522_v4 = vadd.f32 %v3073_v21, %v1493_v24  ;;  %v2574_v15 = vld [vmem:[%s3116_s4] ss:$0 sm:$0xff] }
 0x15b   : > { %2379 = vmatmul.msk.bf16.vlgmr.msrb.gmra.mxu0 %vm1672_vm0, %v1648_v34  ;;  %v1597_v19 = vadd.f32 %v1596_v1, %v1568_v17  ;;  %v1551_v47 = vadd.f32 %v1550_v32, %v1522_v4 }
 0x15d   : > { %v1626_v28 = vadd.f32 %v1625_v5, %v1597_v19 }
 0x15f   : > { %v1642_v39 = vmax.f32 %v1626_v28, 0.0 }
 0x160   : > { %v1569_v22 = vpop.f32.mrf.mxu1 }
 0x161   : > { %v1570_v25 = vadd.f32 %v1569_v22, %v1541_v18  ;;  %v1606_v62 = vpop.f32.mrf.mxu2  ;;  %v1635_v2 = vpop.f32.mrf.mxu3 }
 0x163   : > { %v1599_v29 = vadd.f32 %v1598_v38, %v1570_v25 }
 0x165   : > { %v1628_v30 = vadd.f32 %v1627_v23, %v1599_v29 }
 0x167   : > { %v1643_v40 = vmax.f32 %v1628_v30, 0.0 }
 0x168   : > { %v1572_v42 = vpop.f32.mrf.mxu1 }
 0x169   : > { %v1649_v45 = vpack.c.bf16 %v1643_v40, %v1642_v39  ;;  %v1573_v8 = vadd.f32 %v1572_v42, %v1544_v43  ;;  %v1608_v36 = vpop.f32.mrf.mxu2  ;;  %v1637_v58 = vpop.f32.mrf.mxu3 }
 0x16b   : > { %2380 = vmatmul.msk.bf16.gmra.mxu0 %vm1672_vm0, %v1649_v45  ;;  %v1602_v35 = vadd.f32 %v1601_v20, %v1573_v8 }
 0x16d   : > { %v1631_v55 = vadd.f32 %v1630_v37, %v1602_v35 }
 0x16f   : > { %v1644_v60 = vmax.f32 %v1631_v55, 0.0 }
 0x170   : > { %v1574_v50 = vpop.f32.mrf.mxu1 }
 0x171   : > { %v1575_v51 = vadd.f32 %v1574_v50, %v1546_v52 }
 0x173   : > { %v1604_v33 = vadd.f32 %v1603_v48, %v1575_v51 }
 0x175   : > { %v1633_v56 = vadd.f32 %v1632_v49, %v1604_v33 }
 0x177   : > { %v1645_v61 = vmax.f32 %v1633_v56, 0.0 }
 0x178   : > { %v1577_v63 = vpop.f32.mrf.mxu1 }
 0x179   : > { %v1650_v1 = vpack.c.bf16 %v1645_v61, %v1644_v60  ;;  %v1578_v7 = vadd.f32 %v1577_v63, %v1549_v0 }
 0x17b   : > { %2381 = vmatmul.msk.bf16.gmra.mxu0 %vm1672_vm0, %v1650_v1  ;;  %v1607_v5 = vadd.f32 %v1606_v62, %v1578_v7 }
 0x17d   : > { %v1636_v3 = vadd.f32 %v1635_v2, %v1607_v5 }
 0x17f   : > { %v1646_v11 = vmax.f32 %v1636_v3, 0.0 }
 0x180   : > { %v1579_v6 = vpop.f32.mrf.mxu1 }
 0x181   : > { %v1580_v59 = vadd.f32 %v1579_v6, %v1551_v47 }
 0x183   : > { %v1609_v26 = vadd.f32 %v1608_v36, %v1580_v59 }
 0x185   : > { %v1638_v9 = vadd.f32 %v1637_v58, %v1609_v26 }
 0x187   : > { %v1647_v44 = vmax.f32 %v1638_v9, 0.0 }
 0x189   : > { %v1651_v13 = vpack.c.bf16 %v1647_v44, %v1646_v11 }
 0x18b   : > { %2382 = vmatmul.msk.bf16.vlgmr.msrb.gmra.mxu2 %vm1672_vm0, %v1651_v13 }
 0x1d8   : > { %v1694_v21 = vpop.f32.mrf.mxu0 }
 0x1d9   : > { %v1695_v34 = vadd.f32 %v2574_v15, %v1694_v21 }
 0x1e0   : > { %v1696_v14 = vpop.f32.mrf.mxu0 }
 0x1e1   : > { %v1697_v38 = vadd.f32 %v2574_v15, %v1696_v14 }
 0x1e3   : > { %v2534_v16 = vpack.c.bf16 %v1697_v38, %v1695_v34 }
 0x1e5   : > { %2535 = vst [vmem:[%s229_s26] sm:$0xff] %v2534_v16  }
 0x1e8   : > { %v1699_v17 = vpop.f32.mrf.mxu0 }
 0x1e9   : > { %v1700_v31 = vadd.f32 %v2574_v15, %v1699_v17 }
 0x1f0   : > { %v1701_v23 = vpop.f32.mrf.mxu0 }
 0x1f1   : > { %v1702_v18 = vadd.f32 %v2574_v15, %v1701_v23 }
 0x1f3   : > { %v2539_v19 = vpack.c.bf16 %v1702_v18, %v1700_v31 }
 0x1f5   : > { %2551 = vst [vmem:[%s229_s26 + $0x8] sm:$0xff] %v2539_v19  }
 0x1f8   : > { %v1704_v22 = vpop.f32.mrf.mxu0 }
 0x1f9   : > { %v1705_v25 = vadd.f32 %v2574_v15, %v1704_v22 }
 0x200   : > { %v1706_v10 = vpop.f32.mrf.mxu0 }
 0x201   : > { %v1707_v27 = vadd.f32 %v2574_v15, %v1706_v10 }
 0x203   : > { %v2544_v28 = vpack.c.bf16 %v1707_v27, %v1705_v25 }
 0x205   : > { %2552 = vst [vmem:[%s229_s26 + $0x10] sm:$0xff] %v2544_v28  }
 0x20e   : > { %v1709_v29 = vpop.f32.mrf.mxu2 }
 0x20f   : > { %v1710_v30 = vadd.f32 %v2574_v15, %v1709_v29 }
 0x216   : > { %v1711_v20 = vpop.f32.mrf.mxu2 }
 0x217   : > { %v1712_v37 = vadd.f32 %v2574_v15, %v1711_v20 }
 0x219   : > { %v2549_v12 = vpack.c.bf16 %v1712_v37, %v1710_v30 }
 0x21b   : > { %2553 = vst [vmem:[%s229_s26 + $0x18] sm:$0xff] %v2549_v12  }
 0x21c PF: > { %s15_s18 = sadd.s32 1, %s2581_s18  }
 0x21d   : > { %p12_p4 = scmp.ge.s32.totalorder %s15_s18, 4  }
 0x21f   :  { %14 = sbr.rel (!%p12_p4) target bundleno = 1 (0x1), region = 70 }

</bundles_post_ra>
